<compile_context>
chip_gen: v7x
topology: tpu7x:2x2x1
jax: 0.10.0
libtpu: 0.0.40
codegen_flags: <defaults>
</compile_context>

<pallas_src>
import jax
import jax.numpy as jnp
from jax import lax
from jax.experimental import pallas as pl
from jax.experimental.pallas import tpu as pltpu


def _round_up(x, m):
    return (x + m - 1) // m * m


def _vae_kernel(ids_ref, loc_ref, table_ref, locw_ref, out_ref):
    """One batch block (batch on the lane axis).

    ids_ref   : (4, bb)   int32  rows = [win_team, los_team, win_conf+T, los_conf+T]
    loc_ref   : (2, bb)   f32    rows = [win_loc, los_loc]
    table_ref : (8, Kpad) f32/bf16 rows = [sum_d off_mean, sum_d exp(off_lv),
                                           sum_d def_mean, sum_d exp(def_lv), 0,0,0,0]
                                 cols = [teams | confs | zero pad]
    locw_ref  : (1, 1)    f32    location coefficient (SMEM scalar)
    out_ref   : (4, bb)   f32    rows = [win_mean, los_mean, win_var, los_var]
    """
    Kpad = table_ref.shape[1]
    bb = ids_ref.shape[1]
    sel_dtype = table_ref.dtype

    ids = ids_ref[...]                                              # (4, bb)
    iota_k = lax.broadcasted_iota(jnp.int32, (Kpad, bb), 0)

    # "2-hot" selection per game/side over the fused [team | conf] columns.
    # Team ids live in [0, T) and conf ids (already offset) in [T, T+C): no collision,
    # so OR == exact sum of the two one-hots.
    win_sel = ((iota_k == ids[0:1, :]) | (iota_k == ids[2:3, :])).astype(sel_dtype)
    los_sel = ((iota_k == ids[1:2, :]) | (iota_k == ids[3:4, :])).astype(sel_dtype)

    table = table_ref[...]                                          # (8, Kpad)
    # One MXU matmul per side gathers team+conf latent sums for every game at once.
    win = jnp.dot(table, win_sel, preferred_element_type=jnp.float32)   # (8, bb)
    los = jnp.dot(table, los_sel, preferred_element_type=jnp.float32)   # (8, bb)

    loc_w = locw_ref[0, 0]
    loc = loc_ref[...]                                              # (2, bb)

    # ScoreModel: mean = own offense - opponent defense (+ location), var = sum of vars.
    win_mean = win[0:1, :] - los[2:3, :] + loc_w * loc[0:1, :]
    los_mean = los[0:1, :] - win[2:3, :] + loc_w * loc[1:2, :]
    win_var = win[1:2, :] + los[3:4, :]
    los_var = los[1:2, :] + win[3:4, :]

    out_ref[...] = jnp.concatenate([win_mean, los_mean, win_var, los_var], axis=0)


def _choose_block(B, Kpad, block_cap=8192):
    """128-aligned batch block: big (amortize ~0.35us/step), VMEM-safe, >=2 steps if possible."""
    Bp = _round_up(max(B, 1), 128)
    # Rough per-block footprint of the (Kpad, bb) iota/masks/selection intermediates is
    # ~20 B per element; keep it well under every generation's default scoped VMEM.
    vmem_budget = 24 << 20
    cap = max(128, min(block_cap, (vmem_budget // (Kpad * 20)) // 128 * 128))
    # Aim for >= 2 "parallel" grid steps so v7x's two TensorCores both get work.
    half = _round_up(-(-Bp // 2), 128)
    return min(cap, max(128, half))


def vae_forward(params, win_team_id, los_team_id, win_conf_id, los_conf_id,
                win_loc, los_loc, *, block_cap=8192, compute_dtype=jnp.bfloat16):
    """Full VAE forward pass; returns (score_mean, score_var) each of shape (B, 2)."""
    B = win_team_id.shape[0]
    T, _ = params["team_off_mean"].shape
    C = params["conf_off_mean"].shape[0]
    K = T + C
    Kpad = _round_up(K, 128)

    # ---- batch-independent precompute (plain JAX): exp + reduce over D, fuse tables ----
    def red4(m_off, lv_off, m_def, lv_def):
        return jnp.stack([m_off.sum(axis=1), jnp.exp(lv_off).sum(axis=1),
                          m_def.sum(axis=1), jnp.exp(lv_def).sum(axis=1)],
                         axis=0).astype(jnp.float32)                 # (4, N)

    team4 = red4(params["team_off_mean"], params["team_off_log_var"],
                 params["team_def_mean"], params["team_def_log_var"])
    conf4 = red4(params["conf_off_mean"], params["conf_off_log_var"],
                 params["conf_def_mean"], params["conf_def_log_var"])
    table = jnp.concatenate([team4, conf4], axis=1)                  # (4, T+C)
    table = jnp.pad(table, ((0, 4), (0, Kpad - K))).astype(compute_dtype)  # (8, Kpad)

    # ---- per-game inputs, batch on lanes; conf ids offset into the fused table ----
    ids = jnp.stack([win_team_id, los_team_id,
                     win_conf_id + T, los_conf_id + T], axis=0).astype(jnp.int32)  # (4, B)
    loc = jnp.stack([win_loc, los_loc], axis=0).astype(jnp.float32)                # (2, B)

    bb = _choose_block(B, Kpad, block_cap)
    B_pad = _round_up(B, bb)
    if B_pad != B:
        ids = jnp.pad(ids, ((0, 0), (0, B_pad - B)))
        loc = jnp.pad(loc, ((0, 0), (0, B_pad - B)))

    loc_coef = params["loc_coef"].reshape(1, 1).astype(jnp.float32)

    grid = (B_pad // bb,)
    out = pl.pallas_call(
        _vae_kernel,
        out_shape=jax.ShapeDtypeStruct((4, B_pad), jnp.float32),
        grid=grid,
        in_specs=[
            pl.BlockSpec((4, bb), lambda i: (0, i)),                 # ids  (lane block)
            pl.BlockSpec((2, bb), lambda i: (0, i)),                 # loc  (lane block)
            pl.BlockSpec((8, Kpad), lambda i: (0, 0)),               # fused table, resident
            pl.BlockSpec((1, 1), lambda i: (0, 0),
                         memory_space=pltpu.MemorySpace.SMEM),       # loc_coef scalar
        ],
        out_specs=pl.BlockSpec((4, bb), lambda i: (0, i)),
        compiler_params=pltpu.CompilerParams(
            dimension_semantics=("parallel",)),                      # megacore / v7x 2-TC
        cost_estimate=pl.CostEstimate(
            flops=2 * 2 * 8 * Kpad * B_pad,
            transcendentals=0,
            bytes_accessed=(ids.size * 4 + loc.size * 4
                            + table.size * table.dtype.itemsize + 4 * 4 * B_pad)),
    )(ids, loc, table, loc_coef)

    score_mean = out[0:2, :B].T
    score_var = out[2:4, :B].T
    return score_mean, score_var


def _reference_forward(params, wt, lt, wc, lc, wloc, lloc, n_team, n_conf):
    """Pure-JAX reference using the original (un-collapsed) per-dimension math."""
    wt_oh = jax.nn.one_hot(wt, n_team, dtype=jnp.float32)
    lt_oh = jax.nn.one_hot(lt, n_team, dtype=jnp.float32)
    wc_oh = jax.nn.one_hot(wc, n_conf, dtype=jnp.float32)
    lc_oh = jax.nn.one_hot(lc, n_conf, dtype=jnp.float32)

    def enc(oh, m, lv):
        return oh @ m, oh @ jnp.exp(lv)

    p = params
    wto_m, wto_v = enc(wt_oh, p["team_off_mean"], p["team_off_log_var"])
    wtd_m, wtd_v = enc(wt_oh, p["team_def_mean"], p["team_def_log_var"])
    lto_m, lto_v = enc(lt_oh, p["team_off_mean"], p["team_off_log_var"])
    ltd_m, ltd_v = enc(lt_oh, p["team_def_mean"], p["team_def_log_var"])
    wco_m, wco_v = enc(wc_oh, p["conf_off_mean"], p["conf_off_log_var"])
    wcd_m, wcd_v = enc(wc_oh, p["conf_def_mean"], p["conf_def_log_var"])
    lco_m, lco_v = enc(lc_oh, p["conf_off_mean"], p["conf_off_log_var"])
    lcd_m, lcd_v = enc(lc_oh, p["conf_def_mean"], p["conf_def_log_var"])

    loc_w = p["loc_coef"][0]
    win_mean = (wto_m + wco_m - ltd_m - lcd_m).sum(1) + loc_w * wloc
    los_mean = (lto_m + lco_m - wtd_m - wcd_m).sum(1) + loc_w * lloc
    win_var = (wto_v + wco_v + ltd_v + lcd_v).sum(1)
    los_var = (lto_v + lco_v + wtd_v + wcd_v).sum(1)
    return (jnp.stack([win_mean, los_mean], axis=1),
            jnp.stack([win_var, los_var], axis=1))


if __name__ == "__main__":
    # small, VAE-consistent shapes
    n_team, n_conf, n_dim, batch = 64, 16, 32, 8

    key = jax.random.PRNGKey(0)
    k = jax.random.split(key, 10)

    params = {
        # VAE.initialize(): mean maps are given tables, log_var maps are -1.0
        "team_off_mean": jax.random.normal(k[0], (n_team, n_dim), jnp.float32) * 0.1,
        "team_def_mean": jax.random.normal(k[1], (n_team, n_dim), jnp.float32) * 0.1,
        "conf_off_mean": jax.random.normal(k[2], (n_conf, n_dim), jnp.float32) * 0.1,
        "conf_def_mean": jax.random.normal(k[3], (n_conf, n_dim), jnp.float32) * 0.1,
        "team_off_log_var": jnp.full((n_team, n_dim), -1.0, jnp.float32),
        "team_def_log_var": jnp.full((n_team, n_dim), -1.0, jnp.float32),
        "conf_off_log_var": jnp.full((n_conf, n_dim), -1.0, jnp.float32),
        "conf_def_log_var": jnp.full((n_conf, n_dim), -1.0, jnp.float32),
        "loc_coef": jnp.array([1.0], jnp.float32),
    }

    win_team_id = jax.random.randint(k[4], (batch,), 0, n_team, jnp.int32)
    los_team_id = jax.random.randint(k[5], (batch,), 0, n_team, jnp.int32)
    win_conf_id = jax.random.randint(k[6], (batch,), 0, n_conf, jnp.int32)
    los_conf_id = jax.random.randint(k[7], (batch,), 0, n_conf, jnp.int32)
    win_loc = jax.random.bernoulli(k[8], 0.5, (batch,)).astype(jnp.float32)
    los_loc = 1.0 - win_loc

    # Fast path: bf16 selection matrices + bf16 fused table on the MXU (f32 accumulate).
    mean_bf16, var_bf16 = vae_forward(
        params, win_team_id, los_team_id, win_conf_id, los_conf_id, win_loc, los_loc)
    jax.block_until_ready((mean_bf16, var_bf16))

    # Exact path: same kernel with f32 operands.
    mean_f32, var_f32 = vae_forward(
        params, win_team_id, los_team_id, win_conf_id, los_conf_id, win_loc, los_loc,
        compute_dtype=jnp.float32)
    jax.block_until_ready((mean_f32, var_f32))

    ref_mean, ref_var = _reference_forward(
        params, win_team_id, los_team_id, win_conf_id, los_conf_id,
        win_loc, los_loc, n_team, n_conf)

    assert mean_bf16.shape == (batch, 2) and var_bf16.shape == (batch, 2)
    assert jnp.allclose(mean_f32, ref_mean, atol=1e-4, rtol=1e-4)
    assert jnp.allclose(var_f32, ref_var, atol=1e-4, rtol=1e-4)
    # bf16 table quantization costs ~3 decimal digits; one-hots themselves are exact.
    assert jnp.allclose(mean_bf16, ref_mean, atol=2e-2, rtol=2e-2)
    assert jnp.allclose(var_bf16, ref_var, atol=2e-2, rtol=2e-2)

    print("KERNEL_OK")
</pallas_src>

<mosaic_0001>
module attributes {stable_mosaic.version = 11 : i64} {
  func.func @_vae_kernel(%arg0: i32, %arg1: memref<4x128xi32, #tpu.memory_space<vmem>>, %arg2: memref<2x128xf32, #tpu.memory_space<vmem>>, %arg3: memref<8x128xbf16, #tpu.memory_space<vmem>>, %arg4: memref<1x1xf32, #tpu.memory_space<smem>>, %arg5: memref<4x128xf32, #tpu.memory_space<vmem>>) attributes {dimension_semantics = [#tpu.dimension_semantics<parallel>], iteration_bounds = array<i64: 1>, scalar_prefetch = 0 : i64, scratch_operands = 0 : i64, tpu.core_type = #tpu.core_type<tc>, window_params = [{transform_indices = @transform_0, window_bounds = array<i64: 4, 128>}, {transform_indices = @transform_1, window_bounds = array<i64: 2, 128>}, {pipeline_mode = #tpu.pipeline_mode<synchronous>, transform_indices = @transform_2, window_bounds = array<i64: 8, 128>}, {transform_indices = @transform_3, window_bounds = array<i64: 1, 1>}, {transform_indices = @transform_4, window_bounds = array<i64: 4, 128>}]} {
    %c0 = arith.constant 0 : index
    %c0_0 = arith.constant 0 : index
    %0 = vector.load %arg1[%c0, %c0_0] : memref<4x128xi32, #tpu.memory_space<vmem>>, vector<4x128xi32>
    %1 = tpu.iota {dimensions = array<i32: 0>} : vector<128x128xi32>
    %2 = vector.extract_strided_slice %0 {offsets = [0, 0], sizes = [1, 128], strides = [1, 1]} : vector<4x128xi32> to vector<1x128xi32>
    %3 = vector.broadcast %2 : vector<1x128xi32> to vector<128x128xi32>
    %4 = arith.cmpi eq, %1, %3 : vector<128x128xi32>
    %5 = vector.extract_strided_slice %0 {offsets = [2, 0], sizes = [1, 128], strides = [1, 1]} : vector<4x128xi32> to vector<1x128xi32>
    %6 = vector.broadcast %5 : vector<1x128xi32> to vector<128x128xi32>
    %7 = arith.cmpi eq, %1, %6 : vector<128x128xi32>
    %8 = arith.ori %4, %7 : vector<128x128xi1>
    %9 = arith.extui %8 : vector<128x128xi1> to vector<128x128xi32>
    %10 = arith.sitofp %9 : vector<128x128xi32> to vector<128x128xf32>
    %11 = arith.truncf %10 : vector<128x128xf32> to vector<128x128xbf16>
    %12 = vector.extract_strided_slice %0 {offsets = [1, 0], sizes = [1, 128], strides = [1, 1]} : vector<4x128xi32> to vector<1x128xi32>
    %13 = vector.broadcast %12 : vector<1x128xi32> to vector<128x128xi32>
    %14 = arith.cmpi eq, %1, %13 : vector<128x128xi32>
    %15 = vector.extract_strided_slice %0 {offsets = [3, 0], sizes = [1, 128], strides = [1, 1]} : vector<4x128xi32> to vector<1x128xi32>
    %16 = vector.broadcast %15 : vector<1x128xi32> to vector<128x128xi32>
    %17 = arith.cmpi eq, %1, %16 : vector<128x128xi32>
    %18 = arith.ori %14, %17 : vector<128x128xi1>
    %19 = arith.extui %18 : vector<128x128xi1> to vector<128x128xi32>
    %20 = arith.sitofp %19 : vector<128x128xi32> to vector<128x128xf32>
    %21 = arith.truncf %20 : vector<128x128xf32> to vector<128x128xbf16>
    %c0_1 = arith.constant 0 : index
    %c0_2 = arith.constant 0 : index
    %22 = vector.load %arg3[%c0_1, %c0_2] : memref<8x128xbf16, #tpu.memory_space<vmem>>, vector<8x128xbf16>
    %cst = arith.constant dense<0.000000e+00> : vector<8x128xf32>
    %23 = tpu.matmul %22, %11, %cst {dimension_numbers = #tpu.dot_dimension_numbers<[1], [0], [0], [1], [0, 0, 1, 1], [], []>} : vector<8x128xbf16>, vector<128x128xbf16>, vector<8x128xf32> -> vector<8x128xf32>
    %cst_3 = arith.constant dense<0.000000e+00> : vector<8x128xf32>
    %24 = tpu.matmul %22, %21, %cst_3 {dimension_numbers = #tpu.dot_dimension_numbers<[1], [0], [0], [1], [0, 0, 1, 1], [], []>} : vector<8x128xbf16>, vector<128x128xbf16>, vector<8x128xf32> -> vector<8x128xf32>
    %c0_4 = arith.constant 0 : index
    %c0_5 = arith.constant 0 : index
    %25 = memref.load %arg4[%c0_4, %c0_5] : memref<1x1xf32, #tpu.memory_space<smem>>
    %c0_6 = arith.constant 0 : index
    %c0_7 = arith.constant 0 : index
    %26 = vector.load %arg2[%c0_6, %c0_7] : memref<2x128xf32, #tpu.memory_space<vmem>>, vector<2x128xf32>
    %27 = vector.extract_strided_slice %23 {offsets = [0, 0], sizes = [1, 128], strides = [1, 1]} : vector<8x128xf32> to vector<1x128xf32>
    %28 = vector.extract_strided_slice %24 {offsets = [2, 0], sizes = [1, 128], strides = [1, 1]} : vector<8x128xf32> to vector<1x128xf32>
    %29 = arith.subf %27, %28 : vector<1x128xf32>
    %30 = vector.extract_strided_slice %26 {offsets = [0, 0], sizes = [1, 128], strides = [1, 1]} : vector<2x128xf32> to vector<1x128xf32>
    %31 = vector.broadcast %25 : f32 to vector<1x128xf32>
    %32 = arith.mulf %31, %30 : vector<1x128xf32>
    %33 = arith.addf %29, %32 : vector<1x128xf32>
    %34 = vector.extract_strided_slice %24 {offsets = [0, 0], sizes = [1, 128], strides = [1, 1]} : vector<8x128xf32> to vector<1x128xf32>
    %35 = vector.extract_strided_slice %23 {offsets = [2, 0], sizes = [1, 128], strides = [1, 1]} : vector<8x128xf32> to vector<1x128xf32>
    %36 = arith.subf %34, %35 : vector<1x128xf32>
    %37 = vector.extract_strided_slice %26 {offsets = [1, 0], sizes = [1, 128], strides = [1, 1]} : vector<2x128xf32> to vector<1x128xf32>
    %38 = vector.broadcast %25 : f32 to vector<1x128xf32>
    %39 = arith.mulf %38, %37 : vector<1x128xf32>
    %40 = arith.addf %36, %39 : vector<1x128xf32>
    %41 = vector.extract_strided_slice %23 {offsets = [1, 0], sizes = [1, 128], strides = [1, 1]} : vector<8x128xf32> to vector<1x128xf32>
    %42 = vector.extract_strided_slice %24 {offsets = [3, 0], sizes = [1, 128], strides = [1, 1]} : vector<8x128xf32> to vector<1x128xf32>
    %43 = arith.addf %41, %42 : vector<1x128xf32>
    %44 = vector.extract_strided_slice %24 {offsets = [1, 0], sizes = [1, 128], strides = [1, 1]} : vector<8x128xf32> to vector<1x128xf32>
    %45 = vector.extract_strided_slice %23 {offsets = [3, 0], sizes = [1, 128], strides = [1, 1]} : vector<8x128xf32> to vector<1x128xf32>
    %46 = arith.addf %44, %45 : vector<1x128xf32>
    %47 = tpu.concatenate %33, %40, %43, %46 in 0 : vector<1x128xf32>, vector<1x128xf32>, vector<1x128xf32>, vector<1x128xf32> -> vector<4x128xf32>
    %c0_8 = arith.constant 0 : index
    %c0_9 = arith.constant 0 : index
    %48 = vector.load %arg5[%c0_8, %c0_9] : memref<4x128xf32, #tpu.memory_space<vmem>>, vector<4x128xf32>
    tpu.vector_store %arg5[%c0_8, %c0_9], %47 {strides = array<i32>} : memref<4x128xf32, #tpu.memory_space<vmem>>, vector<4x128xf32>,
    return
  }
  func.func @transform_0(%arg0: i32) -> (i32, i32) {
    %c0_i32 = arith.constant 0 : i32
    %c0_i32_0 = arith.constant 0 : i32
    return %c0_i32, %arg0 : i32, i32
  }
  func.func @transform_1(%arg0: i32) -> (i32, i32) {
    %c0_i32 = arith.constant 0 : i32
    %c0_i32_0 = arith.constant 0 : i32
    return %c0_i32, %arg0 : i32, i32
  }
  func.func @transform_2(%arg0: i32) -> (i32, i32) {
    %c0_i32 = arith.constant 0 : i32
    %c0_i32_0 = arith.constant 0 : i32
    %c0_i32_1 = arith.constant 0 : i32
    return %c0_i32, %c0_i32_0 : i32, i32
  }
  func.func @transform_3(%arg0: i32) -> (i32, i32) {
    %c0_i32 = arith.constant 0 : i32
    %c0_i32_0 = arith.constant 0 : i32
    %c0_i32_1 = arith.constant 0 : i32
    return %c0_i32, %c0_i32_0 : i32, i32
  }
  func.func @transform_4(%arg0: i32) -> (i32, i32) {
    %c0_i32 = arith.constant 0 : i32
    %c0_i32_0 = arith.constant 0 : i32
    return %c0_i32, %arg0 : i32, i32
  }
}

</mosaic_0001>

<bundles_post_ra>
// kernel: tpu_custom_call.1
= control target key start
LH: loop header
LB: loop body
LE: loop exit
PB: predicated region body
PF: predicated region fallthrough
CT: control target
= control target key end

     0   :  { %10 = vsyncpa [#allocation4], 0  ;;  %s742_s0 = inlined_call_operand.hbm [shape: s32[4,128], index: 0, kind: input, shape index: {}]   ;;  %s743_s1 = inlined_call_operand.vmem [shape: f32[2,128], index: 1, kind: input, shape index: {}]   ;;  %s744_s2 = inlined_call_operand.vmem [shape: bf16[8,128], index: 2, kind: input, shape index: {}]   ;;  %s745_s3 = inlined_call_operand.<no memory space> [shape: f32[1,1], index: 3, kind: input, shape index: {}]   ;;  %s746_s4 = inlined_call_operand.hbm [shape: f32[4,128], index: 4, kind: output, shape index: {}]  }
   0x1   :  { %11 = vsyncpa [#allocation5], 0  ;;  %s548_s15 = smov [#allocation3]   ;;  %s500_s19 = scalar_lea.hbm %s742_s0, 64 }
   0x2   :  { %s18_s16 = sshll.u32 %s548_s15, 4  ;;  %p501_p0 = scmp.ne.s32.totalorder %s742_s0, %s500_s19  ;;  %s19_s16 = int_to_ptr.vmem [resolvable:$true] %s18_s16 }
   0x3   :  { %p504_p1 = scmp.lt.u32.totalorder %s500_s19, %s742_s0 }
   0x5   :  { %p506_p2 = pnand %p504_p1, %p501_p0 }
   0x7   :  { %509 = shalt.err (!%p506_p2)
}
   0x8   :  { %s510_s24 = scalar_lea.vmem %s19_s16, 64  ;;  %p515_p4 = scmp.lt.s32.totalorder %s19_s16, %s19_s16 }
   0x9   :  { %p511_p3 = scmp.ne.s32.totalorder %s19_s16, %s510_s24  ;;  %p516_p5 = scmp.lt.s32.totalorder %s510_s24, %s510_s24 }
   0xb   :  { %p517_p6 = por %p516_p5, %p515_p4 }
   0xd   :  { %p518_p7 = pnand %p517_p6, %p511_p3 }
   0xf   :  { %521 = shalt.err (!%p518_p7)
}
  0x10   :  { %21 = dma.hbm_to_vmem [thread:$0]  %s742_s0, 64, %s19_s16, [#allocation4]  }
  0x11   :  { %544 = dma.done.wait [#allocation4], 64  }
  0x12   :  { %545 = vsyncadd [#allocation4], 4294967232  ;;  %v33_v0 = vlaneseq  ;;  %v549_v1 = vmov 0.0   ;;  %vm550_vm0 = vmmov 0   ;;  %v32_v8 = vld [vmem:[#allocation3] sm:$0xf]  ;;  %v329_v30 = vstv %s745_s3 }
  0x13   :  { %455 = vmatprep.subr.bf16.mxu0 %v549_v1  ;;  %475 = vmatprep.subr.bf16.mxu1 %v549_v1  ;;  %v551_v15 = vmov 1.0|1.0   ;;  %v242_v28 = vld [vmem:[%s744_s2] sm:$0xf] }
  0x14   :  { %v592_v2 = vshrl.u32 %v33_v0, 7  ;;  %471 = vmatprep.mubr.msk.bf16.mxu0 %vm550_vm0, %v549_v1  ;;  %491 = vmatprep.mubr.msk.bf16.mxu1 %vm550_vm0, %v549_v1  ;;  %v324_v29 = vld [vmem:[%s743_s1] sm:$0x3]  ;;  %s552_s1 = smov [#allocation6]  }
  0x15   :  { %v330_v31 = vmul.f32 %v329_v30, %v324_v29  ;;  %s364_s2 = sshll.u32 %s552_s1, 4  ;;  %s365_s2 = int_to_ptr.vmem [resolvable:$true] %s364_s2 }
  0x16   :  { %v52_v3 = vsub.s32 0, %v592_v2  ;;  %v72_v4 = vsub.s32 2, %v592_v2  ;;  %v148_v5 = vsub.s32 1, %v592_v2  ;;  %v168_v6 = vsub.s32 3, %v592_v2  ;;  %s522_s3 = scalar_lea.vmem %s365_s2, 64  ;;  %p527_p9 = scmp.lt.s32.totalorder %s365_s2, %s365_s2 }
  0x17   :  { %v35_v7 = vadd.s32 8, %v592_v2  ;;  %v36_v13 = vadd.s32 16, %v592_v2  ;;  %v37_v14 = vadd.s32 24, %v592_v2  ;;  %v38_v16 = vadd.s32 32, %v592_v2  ;;  %p523_p8 = scmp.ne.s32.totalorder %s365_s2, %s522_s3  ;;  %p528_p10 = scmp.lt.s32.totalorder %s522_s3, %s522_s3 }
  0x18   :  { %v601_v9 = vrot.slane %v32_v8, %v52_v3  ;;  %v603_v10 = vrot.slane %v32_v8, %v72_v4  ;;  %v605_v11 = vrot.slane %v32_v8, %v148_v5  ;;  %v607_v12 = vrot.slane %v32_v8, %v168_v6 }
  0x19   :  { %v39_v17 = vadd.s32 40, %v592_v2  ;;  %v40_v18 = vadd.s32 48, %v592_v2  ;;  %v41_v19 = vadd.s32 56, %v592_v2  ;;  %v42_v20 = vadd.s32 64, %v592_v2  ;;  %p529_p11 = por %p528_p10, %p527_p9 }
  0x1a   :  { %vm54_vm1 = vcmp.eq.s32.totalorder %v592_v2, %v601_v9  ;;  %vm55_vm2 = vcmp.eq.s32.totalorder %v35_v7, %v601_v9  ;;  %vm74_vm3 = vcmp.eq.s32.totalorder %v592_v2, %v603_v10  ;;  %vm75_vm4 = vcmp.eq.s32.totalorder %v35_v7, %v603_v10 }
  0x1b   :  { %vm90_vm5 = vmor %vm54_vm1, %vm74_vm3  ;;  %vm150_vm6 = vcmp.eq.s32.totalorder %v592_v2, %v605_v11  ;;  %vm170_vm7 = vcmp.eq.s32.totalorder %v592_v2, %v607_v12  ;;  %vm151_vm9 = vcmp.eq.s32.totalorder %v35_v7, %v605_v11  ;;  %vm171_vm10 = vcmp.eq.s32.totalorder %v35_v7, %v607_v12  ;;  %p530_p12 = pnand %p529_p11, %p523_p8 }
  0x1c   :  { %vm91_vm8 = vmor %vm55_vm2, %vm75_vm4  ;;  %vm56_vm13 = vcmp.eq.s32.totalorder %v36_v13, %v601_v9  ;;  %vm76_vm14 = vcmp.eq.s32.totalorder %v36_v13, %v603_v10  ;;  %vm57_vm0 = vcmp.eq.s32.totalorder %v37_v14, %v601_v9  ;;  %vm77_vm1 = vcmp.eq.s32.totalorder %v37_v14, %v603_v10 }
  0x1d   :  { %vm405_vm11 = vmpackc.low %vm91_vm8, %vm90_vm5  ;;  %vm152_vm4 = vcmp.eq.s32.totalorder %v36_v13, %v605_v11  ;;  %vm172_vm5 = vcmp.eq.s32.totalorder %v36_v13, %v607_v12  ;;  %vm173_vm8 = vcmp.eq.s32.totalorder %v37_v14, %v607_v12  ;;  %v43_v21 = vadd.s32 72, %v592_v2 }
  0x1e   :  { %456 = vmatpush3.bf16.msk.msra.mxu0 %vm405_vm11, %v551_v15  ;;  %vm186_vm12 = vmor %vm150_vm6, %vm170_vm7  ;;  %vm153_vm7 = vcmp.eq.s32.totalorder %v37_v14, %v605_v11  ;;  %vm58_vm11 = vcmp.eq.s32.totalorder %v38_v16, %v601_v9  ;;  %v44_v22 = vadd.s32 80, %v592_v2  ;;  %v45_v23 = vadd.s32 88, %v592_v2 }
  0x1f   :  { %vm187_vm15 = vmor %vm151_vm9, %vm171_vm10  ;;  %457 = vmatprep.subr.bf16.mxu0 %v549_v1  ;;  %v46_v24 = vadd.s32 96, %v592_v2  ;;  %v47_v25 = vadd.s32 104, %v592_v2  ;;  %v48_v26 = vadd.s32 112, %v592_v2  ;;  %v49_v27 = vadd.s32 120, %v592_v2 }
  0x20   :  { %vm421_vm2 = vmpackc.low %vm187_vm15, %vm186_vm12  ;;  %vm78_vm12 = vcmp.eq.s32.totalorder %v38_v16, %v603_v10  ;;  %vm79_vm15 = vcmp.eq.s32.totalorder %v39_v17, %v603_v10  ;;  %v337_v35 = vrot.slane %v330_v31, 1 }
  0x21   :  { %476 = vmatpush3.bf16.msk.msra.mxu1 %vm421_vm2, %v551_v15  ;;  %vm92_vm3 = vmor %vm56_vm13, %vm76_vm14  ;;  %vm59_vm14 = vcmp.eq.s32.totalorder %v39_v17, %v601_v9  ;;  %vm154_vm2 = vcmp.eq.s32.totalorder %v38_v16, %v605_v11 }
  0x22   :  { %477 = vmatprep.subr.bf16.mxu1 %v549_v1  ;;  %vm93_vm6 = vmor %vm57_vm0, %vm77_vm1 }
  0x23   :  { %vm407_vm9 = vmpackc.low %vm93_vm6, %vm92_vm3  ;;  %vm174_vm3 = vcmp.eq.s32.totalorder %v38_v16, %v607_v12  ;;  %vm175_vm6 = vcmp.eq.s32.totalorder %v39_v17, %v607_v12 }
  0x24   :  { %458 = vmatpush3.bf16.msk.msra.mxu0 %vm407_vm9, %v551_v15  ;;  %vm188_vm10 = vmor %vm152_vm4, %vm172_vm5  ;;  %vm155_vm5 = vcmp.eq.s32.totalorder %v39_v17, %v605_v11  ;;  %vm60_vm9 = vcmp.eq.s32.totalorder %v40_v18, %v601_v9 }
  0x25   :  { %vm189_vm13 = vmor %vm153_vm7, %vm173_vm8  ;;  %459 = vmatprep.subr.bf16.mxu0 %v549_v1 }
  0x26   :  { %vm423_vm0 = vmpackc.low %vm189_vm13, %vm188_vm10  ;;  %vm80_vm10 = vcmp.eq.s32.totalorder %v40_v18, %v603_v10  ;;  %vm81_vm13 = vcmp.eq.s32.totalorder %v41_v19, %v603_v10 }
  0x27   :  { %478 = vmatpush3.bf16.msk.msra.mxu1 %vm423_vm0, %v551_v15  ;;  %vm94_vm1 = vmor %vm58_vm11, %vm78_vm12  ;;  %vm61_vm12 = vcmp.eq.s32.totalorder %v41_v19, %v601_v9  ;;  %vm156_vm0 = vcmp.eq.s32.totalorder %v40_v18, %v605_v11 }
  0x28   :  { %479 = vmatprep.subr.bf16.mxu1 %v549_v1  ;;  %vm95_vm4 = vmor %vm59_vm14, %vm79_vm15 }
  0x29   :  { %vm409_vm7 = vmpackc.low %vm95_vm4, %vm94_vm1  ;;  %vm176_vm1 = vcmp.eq.s32.totalorder %v40_v18, %v607_v12  ;;  %vm177_vm4 = vcmp.eq.s32.totalorder %v41_v19, %v607_v12 }
  0x2a   :  { %460 = vmatpush3.bf16.msk.msra.mxu0 %vm409_vm7, %v551_v15  ;;  %vm190_vm8 = vmor %vm154_vm2, %vm174_vm3  ;;  %vm157_vm3 = vcmp.eq.s32.totalorder %v41_v19, %v605_v11  ;;  %vm62_vm7 = vcmp.eq.s32.totalorder %v42_v20, %v601_v9 }
  0x2b   :  { %vm191_vm11 = vmor %vm155_vm5, %vm175_vm6  ;;  %461 = vmatprep.subr.bf16.mxu0 %v549_v1 }
  0x2c   :  { %vm425_vm14 = vmpackc.low %vm191_vm11, %vm190_vm8  ;;  %vm82_vm8 = vcmp.eq.s32.totalorder %v42_v20, %v603_v10  ;;  %vm83_vm11 = vcmp.eq.s32.totalorder %v43_v21, %v603_v10 }
  0x2d   :  { %480 = vmatpush3.bf16.msk.msra.mxu1 %vm425_vm14, %v551_v15  ;;  %vm96_vm15 = vmor %vm60_vm9, %vm80_vm10  ;;  %vm63_vm10 = vcmp.eq.s32.totalorder %v43_v21, %v601_v9  ;;  %vm158_vm14 = vcmp.eq.s32.totalorder %v42_v20, %v605_v11 }
  0x2e   :  { %481 = vmatprep.subr.bf16.mxu1 %v549_v1  ;;  %vm97_vm2 = vmor %vm61_vm12, %vm81_vm13 }
  0x2f   :  { %vm411_vm5 = vmpackc.low %vm97_vm2, %vm96_vm15  ;;  %vm178_vm15 = vcmp.eq.s32.totalorder %v42_v20, %v607_v12  ;;  %vm179_vm2 = vcmp.eq.s32.totalorder %v43_v21, %v607_v12 }
  0x30   :  { %462 = vmatpush3.bf16.msk.msra.mxu0 %vm411_vm5, %v551_v15  ;;  %vm192_vm6 = vmor %vm156_vm0, %vm176_vm1  ;;  %vm159_vm1 = vcmp.eq.s32.totalorder %v43_v21, %v605_v11  ;;  %vm64_vm5 = vcmp.eq.s32.totalorder %v44_v22, %v601_v9 }
  0x31   :  { %vm193_vm9 = vmor %vm157_vm3, %vm177_vm4  ;;  %463 = vmatprep.subr.bf16.mxu0 %v549_v1 }
  0x32   :  { %vm427_vm12 = vmpackc.low %vm193_vm9, %vm192_vm6  ;;  %vm84_vm6 = vcmp.eq.s32.totalorder %v44_v22, %v603_v10  ;;  %vm85_vm9 = vcmp.eq.s32.totalorder %v45_v23, %v603_v10 }
  0x33   :  { %482 = vmatpush3.bf16.msk.msra.mxu1 %vm427_vm12, %v551_v15  ;;  %vm98_vm13 = vmor %vm62_vm7, %vm82_vm8  ;;  %vm65_vm8 = vcmp.eq.s32.totalorder %v45_v23, %v601_v9  ;;  %vm160_vm12 = vcmp.eq.s32.totalorder %v44_v22, %v605_v11 }
  0x34   :  { %483 = vmatprep.subr.bf16.mxu1 %v549_v1  ;;  %vm99_vm0 = vmor %vm63_vm10, %vm83_vm11 }
  0x35   :  { %vm413_vm3 = vmpackc.low %vm99_vm0, %vm98_vm13  ;;  %vm180_vm13 = vcmp.eq.s32.totalorder %v44_v22, %v607_v12  ;;  %vm181_vm0 = vcmp.eq.s32.totalorder %v45_v23, %v607_v12 }
  0x36   :  { %464 = vmatpush3.bf16.msk.msra.mxu0 %vm413_vm3, %v551_v15  ;;  %vm194_vm4 = vmor %vm158_vm14, %vm178_vm15  ;;  %vm161_vm15 = vcmp.eq.s32.totalorder %v45_v23, %v605_v11  ;;  %vm66_vm3 = vcmp.eq.s32.totalorder %v46_v24, %v601_v9 }
  0x37   :  { %vm195_vm7 = vmor %vm159_vm1, %vm179_vm2  ;;  %465 = vmatprep.subr.bf16.mxu0 %v549_v1 }
  0x38   :  { %vm429_vm10 = vmpackc.low %vm195_vm7, %vm194_vm4  ;;  %vm86_vm4 = vcmp.eq.s32.totalorder %v46_v24, %v603_v10  ;;  %vm87_vm7 = vcmp.eq.s32.totalorder %v47_v25, %v603_v10 }
  0x39   :  { %484 = vmatpush3.bf16.msk.msra.mxu1 %vm429_vm10, %v551_v15  ;;  %vm100_vm11 = vmor %vm64_vm5, %vm84_vm6  ;;  %vm67_vm6 = vcmp.eq.s32.totalorder %v47_v25, %v601_v9  ;;  %vm162_vm10 = vcmp.eq.s32.totalorder %v46_v24, %v605_v11 }
  0x3a   :  { %485 = vmatprep.subr.bf16.mxu1 %v549_v1  ;;  %vm101_vm14 = vmor %vm65_vm8, %vm85_vm9 }
  0x3b   :  { %vm415_vm1 = vmpackc.low %vm101_vm14, %vm100_vm11  ;;  %vm182_vm11 = vcmp.eq.s32.totalorder %v46_v24, %v607_v12  ;;  %vm183_vm14 = vcmp.eq.s32.totalorder %v47_v25, %v607_v12 }
  0x3c   :  { %466 = vmatpush3.bf16.msk.msra.mxu0 %vm415_vm1, %v551_v15  ;;  %vm196_vm2 = vmor %vm160_vm12, %vm180_vm13  ;;  %vm163_vm13 = vcmp.eq.s32.totalorder %v47_v25, %v605_v11  ;;  %vm68_vm1 = vcmp.eq.s32.totalorder %v48_v26, %v601_v9 }
  0x3d   :  { %vm197_vm5 = vmor %vm161_vm15, %vm181_vm0  ;;  %467 = vmatprep.subr.bf16.mxu0 %v549_v1 }
  0x3e   :  { %vm431_vm8 = vmpackc.low %vm197_vm5, %vm196_vm2  ;;  %vm88_vm2 = vcmp.eq.s32.totalorder %v48_v26, %v603_v10  ;;  %vm89_vm5 = vcmp.eq.s32.totalorder %v49_v27, %v603_v10 }
  0x3f   :  { %486 = vmatpush3.bf16.msk.msra.mxu1 %vm431_vm8, %v551_v15  ;;  %vm102_vm9 = vmor %vm66_vm3, %vm86_vm4  ;;  %vm69_vm4 = vcmp.eq.s32.totalorder %v49_v27, %v601_v9  ;;  %vm164_vm8 = vcmp.eq.s32.totalorder %v48_v26, %v605_v11 }
  0x40   :  { %487 = vmatprep.subr.bf16.mxu1 %v549_v1  ;;  %vm103_vm12 = vmor %vm67_vm6, %vm87_vm7 }
  0x41   :  { %vm417_vm15 = vmpackc.low %vm103_vm12, %vm102_vm9  ;;  %vm184_vm9 = vcmp.eq.s32.totalorder %v48_v26, %v607_v12  ;;  %vm185_vm12 = vcmp.eq.s32.totalorder %v49_v27, %v607_v12 }
  0x42   :  { %468 = vmatpush3.bf16.msk.msra.mxu0 %vm417_vm15, %v551_v15  ;;  %vm198_vm0 = vmor %vm162_vm10, %vm182_vm11  ;;  %vm165_vm11 = vcmp.eq.s32.totalorder %v49_v27, %v605_v11 }
  0x43   :  { %vm199_vm3 = vmor %vm163_vm13, %vm183_vm14  ;;  %469 = vmatprep.subr.bf16.mxu0 %v549_v1 }
  0x44   :  { %vm433_vm6 = vmpackc.low %vm199_vm3, %vm198_vm0  ;;  %vm355_vm3 = vcmask 1042432  }
  0x45   :  { %488 = vmatpush3.bf16.msk.msra.mxu1 %vm433_vm6, %v551_v15  ;;  %vm104_vm7 = vmor %vm68_vm1, %vm88_vm2  ;;  %vm351_vm1 = vcmask 1040384   ;;  %vm353_vm2 = vcmask 1041408  }
  0x46   :  { %489 = vmatprep.subr.bf16.mxu1 %v549_v1  ;;  %vm105_vm10 = vmor %vm69_vm4, %vm89_vm5 }
  0x47   :  { %vm419_vm13 = vmpackc.low %vm105_vm10, %vm104_vm7 }
  0x48   :  { %470 = vmatpush3.bf16.msk.msra.mxu0 %vm419_vm13, %v551_v15  ;;  %vm200_vm14 = vmor %vm164_vm8, %vm184_vm9 }
  0x49   :  { %vm201_vm15 = vmor %vm165_vm11, %vm185_vm12 }
  0x4a   :  { %vm435_vm0 = vmpackc.low %vm201_vm15, %vm200_vm14 }
  0x4b   :  { %490 = vmatpush3.bf16.msk.msra.mxu1 %vm435_vm0, %v551_v15  ;;  %472 = vmatmul.mubr.bf16.vlgmr.msra.gmra.mrb[0].mxu0 %v242_v28 }
  0x4e   :  { %492 = vmatmul.mubr.bf16.vlgmr.msra.gmra.mrb[0].mxu1 %v242_v28 }
 0x11e   :  { %v277_v32 = vpop.f32.mrb[0].mxu0 }
 0x11f   :  { %v333_v33 = vrot.slane %v277_v32, 2  ;;  %v473_v34 = vpop.f32.mrb[1].mxu0 }
 0x120   :  { %v280_v36 = vpop.f32.mrb[2].mxu0 }
 0x121   :  { %v317_v37 = vpop.f32.mrb[0].mxu1  ;;  %v474_v38 = vpop.f32.mrb[3].mxu0 }
 0x122   :  { %v326_v39 = vrot.slane %v317_v37, 2  ;;  %v335_v40 = vsub.f32 %v317_v37, %v333_v33  ;;  %v341_v41 = vadd.f32 %v333_v33, %v317_v37  ;;  %v493_v42 = vpop.f32.mrb[1].mxu1 }
 0x123   :  { %v320_v43 = vpop.f32.mrb[2].mxu1 }
 0x124   :  { %v328_v44 = vsub.f32 %v277_v32, %v326_v39  ;;  %v339_v45 = vadd.f32 %v337_v35, %v335_v40  ;;  %v340_v46 = vadd.f32 %v326_v39, %v277_v32  ;;  %v494_v47 = vpop.f32.mrb[3].mxu1  ;;  %v349_v51 = vrot.slane %v341_v41, 6 }
 0x126   :  { %v331_v48 = vadd.f32 %v330_v31, %v328_v44  ;;  %v343_v49 = vrot.slane %v339_v45, 7  ;;  %v346_v50 = vrot.slane %v340_v46, 7 }
 0x128   :  { %v352_v52 = vsel %vm351_vm1, %v331_v48, %v343_v49 }
 0x129   :  { %v354_v53 = vsel %vm353_vm2, %v352_v52, %v346_v50 }
 0x12a   :  { %v356_v54 = vsel %vm355_vm3, %v354_v53, %v349_v51 }
 0x12b   :  { %357 = vst [vmem:[#allocation6] sm:$0xf] %v356_v54 }
 0x12c   :  { %533 = shalt.err (!%p530_p12)
}
 0x12d   :  { %s534_s8 = scalar_lea.hbm %s746_s4, 64 }
 0x12e   :  { %p535_p13 = scmp.ne.s32.totalorder %s746_s4, %s534_s8  ;;  %p538_p0 = scmp.lt.u32.totalorder %s534_s8, %s746_s4 }
 0x130   :  { %p540_p1 = pnand %p538_p0, %p535_p13 }
 0x132   :  { %543 = shalt.err (!%p540_p1)
}
 0x133   :  { %367 = dma.vmem_to_hbm [thread:$0]  %s365_s2, 64, %s746_s4, [#allocation5]  }
 0x134   :  { %546 = dma.done.wait [#allocation5], 64  }
 0x135   :  { %547 = vsyncadd [#allocation5], 4294967232 }
 0x136   :  { %371 = vsyncpa [#allocation4], 1 }
 0x137   :  { %372 = vsyncpa [#allocation5], 1 }

</bundles_post_ra>
